<compile_context>
chip_gen: v7x
topology: tpu7x:2x2x1
jax: 0.10.0
libtpu: 0.0.40
codegen_flags: <defaults>
</compile_context>

<pallas_src>
import functools

import jax
import jax.numpy as jnp
from jax import lax
from jax.experimental import pallas as pl
from jax.experimental.pallas import tpu as pltpu


def _ln_mod_kernel(mul_ref, add_ref, h_ref, out_ref, *, eps):
    # mul_ref, add_ref : (1, 1, D) f32  per-batch fused modulation params
    # h_ref, out_ref   : (1, TS, D)     current (batch, seq-tile) slab
    h = h_ref[...].astype(jnp.float32)
    mean = jnp.mean(h, axis=-1, keepdims=True)
    centered = h - mean
    var = jnp.mean(centered * centered, axis=-1, keepdims=True)
    hn = centered * lax.rsqrt(var + eps)
    # Fused LayerNorm-affine + modulation: hn * (gamma*(1+scale)) + (beta*(1+scale)+shift)
    out_ref[...] = (hn * mul_ref[...] + add_ref[...]).astype(out_ref.dtype)


def _pick_seq_tile(S, D, itemsize):
    """Pick a sequence-tile size: <= ~4 MiB per input tile, multiple of 8."""
    max_rows = max(8, (4 * 1024 * 1024) // max(1, D * itemsize))
    if S <= max_rows:
        return S
    ts = min(max_rows, 1024)
    return max(8, (ts // 8) * 8)


def cogvideox_layer_norm_zero(hidden_states, temb, linear_w, linear_b,
                              ln_gamma, ln_beta, *, eps=1e-5, seq_tile=None):
    """Pallas implementation of SimpleCogVideoXLayerNormZero.forward.

    hidden_states: (B, S, D)
    temb:          (B, C)
    linear_w:      (3D, C)   (PyTorch nn.Linear weight layout)
    linear_b:      (3D,)
    ln_gamma, ln_beta: (D,)
    Returns (hidden_states_out (B, S, D), gate (B, 1, D)).
    """
    B, S, D = hidden_states.shape

    # --- SiLU + Linear modulation, hoisted out of the kernel (tiny M=1 matmul) ---
    t = temb.astype(jnp.float32)
    t = t * jax.nn.sigmoid(t)
    mod = jnp.dot(t, linear_w.astype(jnp.float32).T) + linear_b.astype(jnp.float32)
    shift = mod[:, :D]
    scale = mod[:, D:2 * D]
    gate = mod[:, 2 * D:]

    one_plus_scale = 1.0 + scale                                       # (B, D)
    mul = (ln_gamma.astype(jnp.float32)[None, :] * one_plus_scale)     # (B, D)
    add = (ln_beta.astype(jnp.float32)[None, :] * one_plus_scale + shift)
    mul3 = mul[:, None, :]                                             # (B, 1, D)
    add3 = add[:, None, :]                                             # (B, 1, D)

    # --- Sequence-tiled LayerNorm + modulation kernel ---
    TS = seq_tile if seq_tile is not None else _pick_seq_tile(
        S, D, jnp.dtype(hidden_states.dtype).itemsize)
    grid = (B, pl.cdiv(S, TS))

    per_batch_row = lambda b, s: (b, 0, 0)
    per_tile = lambda b, s: (b, s, 0)

    kernel = functools.partial(_ln_mod_kernel, eps=eps)

    out = pl.pallas_call(
        kernel,
        out_shape=jax.ShapeDtypeStruct((B, S, D), hidden_states.dtype),
        grid_spec=pltpu.PrefetchScalarGridSpec(
            num_scalar_prefetch=0,
            grid=grid,
            in_specs=[
                pl.BlockSpec((1, 1, D), per_batch_row),    # mul
                pl.BlockSpec((1, 1, D), per_batch_row),    # add
                pl.BlockSpec((1, TS, D), per_tile),        # hidden_states tile
            ],
            out_specs=pl.BlockSpec((1, TS, D), per_tile),  # output tile
        ),
        compiler_params=pltpu.CompilerParams(
            dimension_semantics=("parallel", "parallel"),
            vmem_limit_bytes=56 * 1024 * 1024),
    )(mul3, add3, hidden_states)

    return out, gate.astype(temb.dtype)[:, None, :]


def _reference(hidden_states, temb, linear_w, linear_b, ln_gamma, ln_beta, eps=1e-5):
    # Pure-JAX reference mirroring the PyTorch module.
    t = temb * jax.nn.sigmoid(temb)
    mod = t @ linear_w.T + linear_b
    D = hidden_states.shape[-1]
    shift, scale, gate = mod[:, :D], mod[:, D:2 * D], mod[:, 2 * D:]
    mean = jnp.mean(hidden_states, axis=-1, keepdims=True)
    var = jnp.mean((hidden_states - mean) ** 2, axis=-1, keepdims=True)
    hn = (hidden_states - mean) / jnp.sqrt(var + eps)
    hn = hn * ln_gamma + ln_beta
    out = hn * (1 + scale)[:, None, :] + shift[:, None, :]
    return out, gate[:, None, :]


if __name__ == "__main__":
    B, S = 2, 8                 # batch, sequence length
    C, D = 16, 32               # conditioning_dim, embedding_dim
    eps = 1e-5

    key = jax.random.PRNGKey(0)
    k_h, k_t, k_w, k_b, k_g, k_be = jax.random.split(key, 6)

    hidden_states = jax.random.normal(k_h, (B, S, D), dtype=jnp.float32)
    temb = jax.random.normal(k_t, (B, C), dtype=jnp.float32)

    # Deterministic parameter init (shapes per nn.Linear(C, 3D) / nn.LayerNorm(D)).
    linear_w = jax.random.normal(k_w, (3 * D, C), dtype=jnp.float32) * 0.05
    linear_b = jax.random.normal(k_b, (3 * D,), dtype=jnp.float32) * 0.05
    ln_gamma = 1.0 + 0.1 * jax.random.normal(k_g, (D,), dtype=jnp.float32)
    ln_beta = 0.1 * jax.random.normal(k_be, (D,), dtype=jnp.float32)

    out, gate = cogvideox_layer_norm_zero(
        hidden_states, temb, linear_w, linear_b, ln_gamma, ln_beta, eps=eps)
    out = jax.block_until_ready(out)
    gate = jax.block_until_ready(gate)

    ref_out, ref_gate = _reference(
        hidden_states, temb, linear_w, linear_b, ln_gamma, ln_beta, eps=eps)

    assert out.shape == (B, S, D) and gate.shape == (B, 1, D)
    assert jnp.allclose(out, ref_out, atol=1e-5, rtol=1e-5)
    assert jnp.allclose(gate, ref_gate, atol=1e-5, rtol=1e-5)

    print("KERNEL_OK")
</pallas_src>

<mosaic_0001>
module attributes {stable_mosaic.version = 11 : i64} {
  func.func @_ln_mod_kernel(%arg0: i32, %arg1: i32, %arg2: memref<1x1x32xf32, #tpu.memory_space<vmem>>, %arg3: memref<1x1x32xf32, #tpu.memory_space<vmem>>, %arg4: memref<1x8x32xf32, #tpu.memory_space<vmem>>, %arg5: memref<1x8x32xf32, #tpu.memory_space<vmem>>) attributes {dimension_semantics = [#tpu.dimension_semantics<parallel>, #tpu.dimension_semantics<parallel>], iteration_bounds = array<i64: 2, 1>, scalar_prefetch = 0 : i64, scratch_operands = 0 : i64, tpu.core_type = #tpu.core_type<tc>, window_params = [{transform_indices = @transform_0, window_bounds = array<i64: 1, 1, 32>}, {transform_indices = @transform_1, window_bounds = array<i64: 1, 1, 32>}, {transform_indices = @transform_2, window_bounds = array<i64: 1, 8, 32>}, {transform_indices = @transform_3, window_bounds = array<i64: 1, 8, 32>}]} {
    %c0 = arith.constant 0 : index
    %c0_0 = arith.constant 0 : index
    %c0_1 = arith.constant 0 : index
    %0 = vector.load %arg4[%c0, %c0_0, %c0_1] : memref<1x8x32xf32, #tpu.memory_space<vmem>>, vector<1x8x32xf32>
    %cst = arith.constant dense<0.000000e+00> : vector<1x8xf32>
    %1 = vector.multi_reduction <add>, %0, %cst [2] : vector<1x8x32xf32> to vector<1x8xf32>
    %2 = vector.shape_cast %1 : vector<1x8xf32> to vector<1x8x1xf32>
    %cst_2 = arith.constant 3.200000e+01 : f32
    %3 = vector.broadcast %cst_2 : f32 to vector<1x8x1xf32>
    %4 = arith.divf %2, %3 : vector<1x8x1xf32>
    %5 = vector.broadcast %4 : vector<1x8x1xf32> to vector<1x8x32xf32>
    %6 = arith.subf %0, %5 : vector<1x8x32xf32>
    %7 = arith.mulf %6, %6 : vector<1x8x32xf32>
    %cst_3 = arith.constant dense<0.000000e+00> : vector<1x8xf32>
    %8 = vector.multi_reduction <add>, %7, %cst_3 [2] : vector<1x8x32xf32> to vector<1x8xf32>
    %9 = vector.shape_cast %8 : vector<1x8xf32> to vector<1x8x1xf32>
    %cst_4 = arith.constant 3.200000e+01 : f32
    %10 = vector.broadcast %cst_4 : f32 to vector<1x8x1xf32>
    %11 = arith.divf %9, %10 : vector<1x8x1xf32>
    %cst_5 = arith.constant 9.99999974E-6 : f32
    %12 = vector.broadcast %cst_5 : f32 to vector<1x8x1xf32>
    %13 = arith.addf %11, %12 : vector<1x8x1xf32>
    %14 = math.rsqrt %13 : vector<1x8x1xf32>
    %15 = vector.broadcast %14 : vector<1x8x1xf32> to vector<1x8x32xf32>
    %16 = arith.mulf %6, %15 : vector<1x8x32xf32>
    %c0_6 = arith.constant 0 : index
    %c0_7 = arith.constant 0 : index
    %c0_8 = arith.constant 0 : index
    %17 = vector.load %arg2[%c0_6, %c0_7, %c0_8] : memref<1x1x32xf32, #tpu.memory_space<vmem>>, vector<1x1x32xf32>
    %18 = vector.broadcast %17 : vector<1x1x32xf32> to vector<1x8x32xf32>
    %19 = arith.mulf %16, %18 : vector<1x8x32xf32>
    %c0_9 = arith.constant 0 : index
    %c0_10 = arith.constant 0 : index
    %c0_11 = arith.constant 0 : index
    %20 = vector.load %arg3[%c0_9, %c0_10, %c0_11] : memref<1x1x32xf32, #tpu.memory_space<vmem>>, vector<1x1x32xf32>
    %21 = vector.broadcast %20 : vector<1x1x32xf32> to vector<1x8x32xf32>
    %22 = arith.addf %19, %21 : vector<1x8x32xf32>
    %c0_12 = arith.constant 0 : index
    %c0_13 = arith.constant 0 : index
    %c0_14 = arith.constant 0 : index
    %23 = vector.load %arg5[%c0_12, %c0_13, %c0_14] : memref<1x8x32xf32, #tpu.memory_space<vmem>>, vector<1x8x32xf32>
    tpu.vector_store %arg5[%c0_12, %c0_13, %c0_14], %22 {strides = array<i32>} : memref<1x8x32xf32, #tpu.memory_space<vmem>>, vector<1x8x32xf32>,
    return
  }
  func.func @transform_0(%arg0: i32, %arg1: i32) -> (i32, i32, i32) {
    %c0_i32 = arith.constant 0 : i32
    %c0_i32_0 = arith.constant 0 : i32
    %c0_i32_1 = arith.constant 0 : i32
    return %arg0, %c0_i32, %c0_i32_0 : i32, i32, i32
  }
  func.func @transform_1(%arg0: i32, %arg1: i32) -> (i32, i32, i32) {
    %c0_i32 = arith.constant 0 : i32
    %c0_i32_0 = arith.constant 0 : i32
    %c0_i32_1 = arith.constant 0 : i32
    return %arg0, %c0_i32, %c0_i32_0 : i32, i32, i32
  }
  func.func @transform_2(%arg0: i32, %arg1: i32) -> (i32, i32, i32) {
    %c0_i32 = arith.constant 0 : i32
    %c0_i32_0 = arith.constant 0 : i32
    return %arg0, %arg1, %c0_i32 : i32, i32, i32
  }
  func.func @transform_3(%arg0: i32, %arg1: i32) -> (i32, i32, i32) {
    %c0_i32 = arith.constant 0 : i32
    %c0_i32_0 = arith.constant 0 : i32
    return %arg0, %arg1, %c0_i32 : i32, i32, i32
  }
}

</mosaic_0001>

<bundles_post_ra>
// kernel: tpu_custom_call.1
= control target key start
LH: loop header
LB: loop body
LE: loop exit
PB: predicated region body
PF: predicated region fallthrough
CT: control target
= control target key end

     0   :  { %8 = vsyncpa [#allocation3], 0  ;;  %s889_s0 = inlined_call_operand.hbm [shape: f32[2,1,32], index: 0, kind: input, shape index: {}]   ;;  %s890_s1 = inlined_call_operand.vmem [shape: f32[2,1,32], index: 1, kind: input, shape index: {}]   ;;  %s891_s2 = inlined_call_operand.hbm [shape: f32[2,8,32], index: 2, kind: input, shape index: {}]   ;;  %s892_s3 = inlined_call_operand.hbm [shape: f32[2,8,32], index: 3, kind: output, shape index: {}]  }
   0x1   :  { %10 = vsyncpa [#allocation3 + $0x1], 0 }
   0x2   :  { %11 = vsyncpa [#allocation6], 0 }
   0x3   :  { %13 = vsyncpa [#allocation6 + $0x1], 0 }
   0x4   :  { %14 = vsyncpa [#allocation4], 0 }
   0x5   :  { %16 = vsyncpa [#allocation4 + $0x1], 0  ;;  %s664_s12 = smov 0   ;;  %s666_s13 = smov 0  }
   0x6   :  { %s668_s14 = smov 0   ;;  %s670_s15 = smov 0  }
   0x7   :  { %s672_s16 = smov 0   ;;  %s674_s17 = smov 0  }
   0x8 LB: > { %s408_s18 = sadd.s32 4294967295, %s639_s17   ;;  %s409_s19 = sadd.s32 4294967294, %s639_s17   ;;  %s639_s17 = sphi %s674_s17, %s22_s17   ;;  %s635_s16 = sphi %s672_s16, %s912_s16   ;;  %s631_s15 = sphi %s670_s15, %s911_s15   ;;  %s627_s14 = sphi %s668_s14, %s910_s14   ;;  %s623_s13 = sphi %s666_s13, %s909_s13   ;;  %s619_s12 = sphi %s664_s12, %s908_s12  }
   0x9   : > { %s34_s20 = sadd.s32 1, %s635_s16  ;;  %s41_s21 = sadd.s32 1, %s627_s14 }
   0xa   : > { %p36_p0 = scmp.ge.s32.totalorder %s34_s20, 2  ;;  %p48_p1 = scmp.ne.s32.totalorder %s627_s14, %s623_s13 }
   0xb   : > { %p49_p2 = scmp.eq.s32.totalorder %s639_s17, 0  ;;  %p54_p3 = scmp.ne.s32.totalorder %s623_s13, %s619_s12 }
   0xc   : > { %s914_s20 = smov (%p36_p0, %s34_s20), 0  ;;  %p55_p5 = scmp.eq.s32.totalorder %s408_s18, 0 }
   0xd   : > { %p705_p4 = por %p49_p2, %p48_p1  ;;  %s38_s23 = ssub.s32 %s635_s16, %s914_s20 }
   0xe   : > { %p134_p6 = scmp.eq.s32.totalorder %s408_s18, 1  ;;  %p39_p7 = scmp.eq.s32.totalorder %s38_s23, 0 }
   0xf   : > { %p711_p8 = por %p55_p5, %p54_p3  ;;  %p140_p10 = scmp.eq.s32.totalorder %s409_s19, 1 }
  0x10   : > { %p715_p9 = por %p134_p6, %p48_p1  ;;  %p441_p13 = scmp.lt.s32.totalorder %s639_s17, 2 }
  0x11   : > { %s896_s24 = scalar_select %p711_p8, 1, 0 }
  0x12   : > { %s897_s25 = scalar_select %p715_p9, 1, 0 }
  0x13   : > { %s720_s26 = scalar_select %p39_p7, %s627_s14, %s41_s21  }
  0x14   : > { %p722_p11 = por %p140_p10, %p54_p3  ;;  %s729_s28 = sand.u32 1, %s627_s14  }
  0x15   : > { %s412_s29 = sshll.u32 %s635_s16, 4  ;;  %s163_s30 = scalar_lea.vmem [#allocation2], %s729_s28 }
  0x16   : > { %s898_s27 = scalar_select %p722_p11, 1, 0 }
  0x17   : > { %s170_s4 = sshll.u32 %s163_s30, 4  ;;  %s736_s7 = scalar_lea.hbm %s889_s0, %s412_s29  ;;  %s738_s4 = int_to_ptr.vmem [resolvable:$true] %s170_s4 }
  0x18   : > { %p742_p0 = pnand %p441_p13, %p705_p4  ;;  %s413_s9 = sshll.u32 %s729_s28, 3 }
  0x19   : > { %s161_s10 = scalar_lea.sflag [#allocation3], %s729_s28  ;;  %s493_s11 = scalar_lea.hbm %s736_s7, 16 }
  0x1a   : > { %p494_p3 = scmp.ne.s32.totalorder %s736_s7, %s493_s11  ;;  %p495_p5 = pneg %p742_p0 }
  0x1b   : > { %s498_s21 = scalar_lea.hbm %s889_s0, 32  ;;  %p499_p4 = scmp.lt.u32.totalorder %s736_s7, %s889_s0 }
  0x1c   : > { %p496_p6 = pnand %p495_p5, %p494_p3  ;;  %p500_p10 = scmp.lt.u32.totalorder %s498_s21, %s493_s11 }
  0x1d   : > { %p502_p12 = scmp.lt.u32.totalorder %s493_s11, %s736_s7 }
  0x1e   : > { %p497_p7 = pneg %p496_p6  ;;  %p501_p13 = por %p500_p10, %p499_p4 }
  0x20   : > { %p503_p1 = por %p502_p12, %p501_p13 }
  0x22   : > { %p504_p2 = pnand %p503_p1, %p497_p7 }
  0x24   : > { %507 = shalt.err (!%p504_p2)
}
  0x25   : > { %s508_s29 = scalar_lea.vmem %s738_s4, 16  ;;  %s641_s30 = smov [#allocation2]  }
  0x26   : > { %p509_p3 = scmp.ne.s32.totalorder %s738_s4, %s508_s29  ;;  %s513_s5 = sshll.u32 %s641_s30, 4  ;;  %s514_s5 = int_to_ptr.vmem [resolvable:$false] %s513_s5 }
  0x27   : > { %s515_s6 = scalar_lea.vmem %s514_s5, 32  ;;  %p516_p9 = scmp.lt.s32.totalorder %s738_s4, %s514_s5 }
  0x28   : > { %p511_p6 = pnand %p509_p3, %p495_p5  ;;  %p517_p4 = scmp.lt.s32.totalorder %s515_s6, %s508_s29 }
  0x2a   : > { %p512_p11 = pneg %p511_p6  ;;  %p518_p10 = por %p517_p4, %p516_p9 }
  0x2c   : > { %p519_p12 = pnand %p518_p10, %p512_p11 }
  0x2e   : > { %522 = shalt.err (!%p519_p12)
}
  0x2f   : > { %433 = dma.hbm_to_vmem [thread:$0]  (!%p742_p0), %s736_s7, 16, %s738_s4, %s161_s10  }
  0x30   : > { %p900_p1 = scmp.lt.s32.totalorder %s639_s17, 3  ;;  %p901_p2 = scmp.ge.s32.totalorder %s639_s17, 1 }
  0x31   : > { %s414_s18 = sshll.u32 %s635_s16, 7  ;;  %s187_s19 = scalar_lea.vmem [#allocation5], %s413_s9 }
  0x32   : > { %p779_p7 = pnand %p901_p2, %p900_p1  ;;  %s195_s21 = sshll.u32 %s187_s19, 4  ;;  %s196_s21 = int_to_ptr.vmem [resolvable:$true] %s195_s21 }
  0x33   : > { %s789_s29 = scalar_lea.hbm %s891_s2, %s414_s18  ;;  %s184_s4 = scalar_lea.sflag [#allocation6], %s729_s28 }
  0x34   : > { %s902_s11 = scalar_select %p779_p7, 1, 0 }
  0x35   : > { %s523_s7 = scalar_lea.hbm %s789_s29, 128  ;;  %s528_s30 = scalar_lea.hbm %s891_s2, 256 }
  0x36   : > { %p524_p9 = scmp.ne.s32.totalorder %s789_s29, %s523_s7  ;;  %p529_p3 = scmp.lt.u32.totalorder %s789_s29, %s891_s2 }
  0x37   : > { %p530_p6 = scmp.lt.u32.totalorder %s528_s30, %s523_s7  ;;  %p532_p10 = scmp.lt.u32.totalorder %s523_s7, %s789_s29 }
  0x38   : > { %p526_p11 = pnand %p524_p9, %p495_p5 }
  0x39   : > { %p531_p4 = por %p530_p6, %p529_p3 }
  0x3a   : > { %p527_p13 = pneg %p526_p11 }
  0x3b   : > { %p533_p12 = por %p532_p10, %p531_p4 }
  0x3d   : > { %p534_p1 = pnand %p533_p12, %p527_p13 }
  0x3f   : > { %537 = shalt.err (!%p534_p1)
}
  0x40   : > { %s538_s28 = scalar_lea.vmem %s196_s21, 128  ;;  %s642_s18 = smov [#allocation5]  }
  0x41   : > { %p539_p2 = scmp.ne.s32.totalorder %s196_s21, %s538_s28  ;;  %s543_s19 = sshll.u32 %s642_s18, 4  ;;  %s544_s19 = int_to_ptr.vmem [resolvable:$false] %s543_s19 }
  0x42   : > { %s545_s22 = scalar_lea.vmem %s544_s19, 256  ;;  %p546_p8 = scmp.lt.s32.totalorder %s196_s21, %s544_s19 }
  0x43   : > { %p541_p9 = pnand %p539_p2, %p495_p5  ;;  %p547_p7 = scmp.lt.s32.totalorder %s545_s22, %s538_s28 }
  0x45   : > { %p542_p11 = pneg %p541_p9  ;;  %p548_p3 = por %p547_p7, %p546_p8 }
  0x47   : > { %p549_p6 = pnand %p548_p3, %p542_p11 }
  0x49   : > { %552 = shalt.err (!%p549_p6)
}
  0x4a   : > { %436 = dma.hbm_to_vmem [thread:$0]  (!%p742_p0), %s789_s29, 128, %s196_s21, %s184_s4  }
  0x4b   : > { %p903_p13 = scmp.ne.s32.totalorder %s902_s11, 0 }
  0x4c   : > { %s814_s23 = sand.u32 (!%p903_p13), 1, %s623_s13   ;;  %p904_p5 = scmp.ne.s32.totalorder (!%p903_p13), %s896_s24, 0 }
  0x4d   : > { %204 = sbr.rel (%p903_p13) target bundleno = 416 (0x1a0), region = 32  ;;  %s207_s7 = scalar_lea.sflag (!%p903_p13), [#allocation3], %s814_s23 }
  0x4e   : > { %s209_s10 = scalar_lea.vmem (!%p903_p13), [#allocation2], %s814_s23 }
  0x54   : > { %606 = dma.done.wait (%p904_p5), %s207_s7, 16  }
  0x55   : > { %608 = vsyncadd (%p904_p5), %s207_s7, 4294967280  ;;  %s416_s8 = sshll.u32 %s814_s23, 3  ;;  %s215_s21 = scalar_lea.sflag [#allocation6], %s814_s23 }
  0x56   : > { %s218_s11 = scalar_lea.vmem [#allocation5], %s416_s8 }
  0x57   : > { %610 = dma.done.wait (%p904_p5), %s215_s21, 128  }
  0x58   : > { %612 = vsyncadd (%p904_p5), %s215_s21, 4294967168  ;;  %vm252_vm0 = vcmask 261120   ;;  %v251_v0 = vld [vmem:[%s218_s11] sm:$0xff]  ;;  %p248_p8 = scmp.lt.s32.totalorder %s631_s15, 1  ;;  %v418_v11 = vld [vmem:[%s209_s10] ss:$0 sm:$0xff] }
  0x59   : > { %v253_v1 = vsel %vm252_vm0, %v251_v0, 0.0  ;;  %s421_s30 = sshll.u32 %s631_s15, 7  ;;  %s247_s5 = scalar_lea.vmem [#allocation7], %s416_s8 }
  0x5a   : > { %254 = vadd.xlane.f32.xlu0 %v253_v1  ;;  %s249_s24 = scalar_select %p248_p8, %s631_s15, 1 }
  0x5b   : > { %s299_s6 = sshll.u32 %s247_s5, 4  ;;  %s839_s19 = scalar_lea.hbm %s892_s3, %s421_s30  ;;  %s841_s6 = int_to_ptr.vmem [resolvable:$true] %s299_s6 }
  0x5c   : > { %s250_s9 = scalar_lea.vmem %s890_s1, %s249_s24  ;;  %s285_s22 = scalar_lea.sflag [#allocation4], %s814_s23 }
  0x5d   : > { %v419_v13 = vld [vmem:[%s250_s9] ss:$0 sm:$0xff]  ;;  %s553_s7 = scalar_lea.vmem %s841_s6, 128  ;;  %p905_p7 = scmp.ne.s32.totalorder %s897_s25, 0 }
  0x5e   : > { %p554_p0 = scmp.ne.s32.totalorder %s841_s6, %s553_s7  ;;  %s643_s15 = smov [#allocation7]  }
  0x5f   : > { %s557_s10 = sshll.u32 %s643_s15, 4  ;;  %s558_s10 = int_to_ptr.vmem [resolvable:$false] %s557_s10 }
  0x60   : > { %p555_p4 = pnand %p554_p0, %p905_p7  ;;  %s559_s8 = scalar_lea.vmem %s558_s10, 256 }
  0x61   : > { %p560_p12 = scmp.lt.s32.totalorder %s841_s6, %s558_s10  ;;  %p561_p1 = scmp.lt.s32.totalorder %s559_s8, %s553_s7 }
  0x62   : > { %p556_p10 = pneg %p555_p4 }
  0x63   : > { %p562_p2 = por %p561_p1, %p560_p12 }
  0x65   : > { %p563_p9 = pnand %p562_p2, %p556_p10 }
  0xe7   : > { %v255_v2 = vpop.xlane.xlu0 %254 }
  0xe8   : > { %v257_v3 = vmul.f32 0.03125, %v255_v2 }
  0xea   : > { %v258_v4 = vsub.f32 %v251_v0, %v257_v3 }
  0xec   : > { %v259_v5 = vmul.f32 %v258_v4, %v258_v4 }
  0xee   : > { %v260_v6 = vsel %vm252_vm0, %v259_v5, 0.0 }
  0xef   : > { %261 = vadd.xlane.f32.xlu0 %v260_v6 }
 0x17c   : > { %v262_v7 = vpop.xlane.xlu0 %261 }
 0x17d   : > { %v263_v8 = vmul.f32 0.03125, %v262_v7 }
 0x17f   : > { %v264_v9 = vadd.f32 1e-05, %v263_v8 }
 0x181   : > { %491 = vrsqrt.f32 %v264_v9 }
 0x18b   : > { %v492_v10 = vpop.eup %491 }
 0x18c   : > { %v266_v12 = vmul.f32 %v492_v10, %v258_v4 }
 0x18e   : > { %v274_v14 = vmul.f32 %v418_v11, %v266_v12 }
 0x190   : > { %v282_v15 = vadd.f32 %v419_v13, %v274_v14 }
 0x192   : > { %283 = vst.msk [vmem:[%s247_s5] sm:$0xff] %vm252_vm0, %v282_v15 }
 0x193   : > { %566 = shalt.err (!%p563_p9)
}
 0x194   : > { %s567_s23 = scalar_lea.hbm %s839_s19, 128  ;;  %s571_s24 = scalar_lea.hbm %s892_s3, 256 }
 0x195   : > { %p568_p11 = scmp.ne.s32.totalorder %s839_s19, %s567_s23  ;;  %p572_p13 = scmp.lt.u32.totalorder %s839_s19, %s892_s3 }
 0x196   : > { %p573_p5 = scmp.lt.u32.totalorder %s571_s24, %s567_s23  ;;  %p575_p0 = scmp.lt.u32.totalorder %s567_s23, %s839_s19 }
 0x197   : > { %p569_p3 = pnand %p568_p11, %p905_p7 }
 0x198   : > { %p574_p8 = por %p573_p5, %p572_p13 }
 0x199   : > { %p570_p6 = pneg %p569_p3 }
 0x19a   : > { %p576_p4 = por %p575_p0, %p574_p8 }
 0x19c   : > { %p577_p10 = pnand %p576_p4, %p570_p6 }
 0x19e   : > { %580 = shalt.err (!%p577_p10)
}
 0x19f   : > { %428 = dma.vmem_to_hbm [thread:$0]  (%p905_p7), %s841_s6, 128, %s839_s19, %s285_s22  }
 0x1a0 PF: > { %s311_s9 = sand.u32 1, %s619_s12   ;;  %p906_p12 = scmp.ne.s32.totalorder %s898_s27, 0 }
 0x1a1   : > { %p907_p1 = scmp.ge.s32.totalorder %s639_s17, 2  ;;  %s312_s30 = scalar_lea.sflag [#allocation4], %s311_s9 }
 0x1a3   : > { %p438_p2 = pnand %p907_p1, %p906_p12 }
 0x1a5   : > { %614 = dma.done.wait (!%p438_p2), %s312_s30, 128  }
 0x1a6   : > { %616 = vsyncadd (!%p438_p2), %s312_s30, 4294967168  ;;  %s22_s17 = sadd.s32 1, %s639_s17   ;;  %s908_s12 = smov %s623_s13 }
 0x1a7   : > { %p19_p9 = scmp.ge.s32.totalorder %s22_s17, 4   ;;  %s909_s13 = smov %s627_s14 }
 0x1a8   : > { %s910_s14 = smov %s720_s26  ;;  %s911_s15 = smov %s635_s16 }
 0x1a9   : > { %s912_s16 = smov %s914_s20  ;;  %21 = sbr.rel (!%p19_p9) target bundleno = 8 (0x8), region = 93 }
 0x1b0   :  { %317 = vsyncpa [#allocation3], 1 }
 0x1b1   :  { %319 = vsyncpa [#allocation3 + $0x1], 1 }
 0x1b2   :  { %320 = vsyncpa [#allocation6], 1 }
 0x1b3   :  { %322 = vsyncpa [#allocation6 + $0x1], 1 }
 0x1b4   :  { %323 = vsyncpa [#allocation4], 1 }
 0x1b5   :  { %325 = vsyncpa [#allocation4 + $0x1], 1 }

</bundles_post_ra>
